<compile_context>
chip_gen: v5e
topology: v5e:2x2
jax: 0.10.0
libtpu: 0.0.40
codegen_flags: <defaults>
</compile_context>

<pallas_src>
import functools

import jax
import jax.numpy as jnp
from jax import lax
from jax.experimental import pallas as pl
from jax.experimental.pallas import tpu as pltpu

EPS = 1e-5  # nn.InstanceNorm2d default


def conv_block_kernel(patches_ref, w_ref, out_ref, sum_ref, sumsq_ref, *,
                      p_real, n_p_tiles, tile_p):
    # patches_ref: (1, CKp, tile_p) bf16     w_ref: (tile_c, CKp) bf16
    # out_ref:     (1, tile_c, Pp)  bf16  -- resident across the P-tile grid axis
    # sum_ref / sumsq_ref: (tile_c, 1) f32 scratch
    # grid = (N, nC, nP); axis 2 (P tiles) is 'arbitrary', the others are 'parallel'.
    j = pl.program_id(2)

    @pl.when(j == 0)
    def _init():
        sum_ref[...] = jnp.zeros_like(sum_ref)
        sumsq_ref[...] = jnp.zeros_like(sumsq_ref)

    # Conv as a channel-major bf16 matmul on the MXU, f32 accumulate.
    # (Bias omitted: it cancels exactly in the InstanceNorm mean subtraction.)
    y = jnp.dot(w_ref[...], patches_ref[0],
                preferred_element_type=jnp.float32)          # (tile_c, tile_p)

    # Per-channel running stats (zero-padded P columns / CK rows contribute exactly 0).
    sum_ref[...] += jnp.sum(y, axis=1, keepdims=True)
    sumsq_ref[...] += jnp.sum(y * y, axis=1, keepdims=True)

    start = pl.multiple_of(j * tile_p, 128)
    out_ref[0, :, pl.ds(start, tile_p)] = y.astype(out_ref.dtype)

    @pl.when(j == n_p_tiles - 1)
    def _finalize():
        inv_p = 1.0 / p_real
        mean = sum_ref[...] * inv_p                                    # (tile_c, 1)
        # One-pass variance; clamp at 0 against f32 cancellation for large-|mean| channels.
        var = jnp.maximum(sumsq_ref[...] * inv_p - mean * mean, 0.0)
        rstd = lax.rsqrt(var + EPS)

        # Normalize + ReLU the resident block in tile_p-wide chunks (keeps f32 temps small).
        @pl.loop(0, n_p_tiles)
        def _(t):
            s = pl.multiple_of(t * tile_p, 128)
            blk = out_ref[0, :, pl.ds(s, tile_p)].astype(jnp.float32)
            out_ref[0, :, pl.ds(s, tile_p)] = jnp.maximum(
                (blk - mean) * rstd, 0.0).astype(out_ref.dtype)


def im2col_cm(x, k, stride, padding):
    """x: (N, C, H, W) -> channel-major patches (N, C*k*k, H_out*W_out)."""
    n, c, h, w = x.shape
    h_out = (h + 2 * padding - k) // stride + 1
    w_out = (w + 2 * padding - k) // stride + 1
    xp = jnp.pad(x, ((0, 0), (0, 0), (padding, padding), (padding, padding)))
    cols = []
    for kh in range(k):
        for kw in range(k):
            cols.append(
                xp[:, :,
                   kh:kh + (h_out - 1) * stride + 1:stride,
                   kw:kw + (w_out - 1) * stride + 1:stride]
            )  # (N, C, H_out, W_out)
    cols = jnp.stack(cols, axis=2)                    # (N, C, k*k, H_out, W_out)
    patches = cols.reshape(n, c * k * k, h_out * w_out)   # order: c major, then kh, kw
    return patches, (h_out, w_out)


def _round_up(x, m):
    return (x + m - 1) // m * m


def _vmem_limit_bytes():
    """Generation-aware scoped-VMEM limit: ~48 MiB on v7x (64 MiB VMEM), 64 MiB on v5e/v6e."""
    try:
        cap = int(pltpu.get_tpu_info().vmem_capacity_bytes)
    except Exception:
        cap = 0
    if cap <= 0:
        cap = 64 * 1024 * 1024  # conservative fallback = v7x per-TensorCore VMEM
    return min((3 * cap) // 4, 64 * 1024 * 1024)


def _choose_tiling(ckp, c_out, p, block_budget):
    """Pick (tile_c, cp, tile_p, pp) so the double-buffered VMEM blocks fit block_budget."""
    p128 = _round_up(p, 128)

    # Channel tile: keep all output channels resident unless the resident bf16 output block
    # (double-buffered) would eat more than half the budget; then shrink (also feeds v7x's
    # second TensorCore via the 'parallel' channel axis for batch-1 workloads).
    tc_full = _round_up(c_out, 8)
    tile_c = 8
    for cand in (tc_full, 512, 256, 128, 64, 32, 16, 8):
        if cand > tc_full:
            continue
        if 2 * cand * p128 * 2 <= block_budget // 2 or cand == 8:
            tile_c = cand
            break
    cp = _round_up(c_out, tile_c)

    # Spatial tile: largest 128-multiple whose blocks (patches + weight + resident output,
    # all double-buffered, plus finalize temporaries) fit; keep P padding waste bounded.
    def fits(tp):
        pp_ = _round_up(p, tp)
        patches = 2 * ckp * tp * 2        # bf16, double-buffered
        weight = 2 * tile_c * ckp * 2     # bf16, double-buffered
        outblk = 2 * tile_c * pp_ * 2     # bf16, double-buffered, P-resident
        finalize = 2 * tile_c * tp * 4    # f32 temps in the finalize loop
        return patches + weight + outblk + finalize <= block_budget

    tile_p = 128
    for cand in (2048, 1024, 512, 256):
        if cand <= p128 and _round_up(p, cand) <= max(p128, (5 * p) // 4) and fits(cand):
            tile_p = cand
            break
    pp = _round_up(p, tile_p)
    return tile_c, cp, tile_p, pp


@functools.partial(jax.jit, static_argnames=("kernel_size", "stride", "padding"))
def conv_block_forward(x, weight, bias, *, kernel_size=3, stride=2, padding=1):
    """x: (N, C_in, H, W) NCHW.  weight: (C_out, C_in, k, k).  bias: (C_out,)."""
    del bias  # algebraically cancelled by InstanceNorm's mean subtraction
    n, c_in, _, _ = x.shape
    c_out = weight.shape[0]
    k = kernel_size

    # Channel-major bf16 im2col: (N, CK, P) -- no wrapper transpose needed.
    patches, (h_out, w_out) = im2col_cm(x.astype(jnp.bfloat16), k, stride, padding)
    p = h_out * w_out
    ck = c_in * k * k
    ckp = _round_up(ck, 8)          # CK is a sublane axis now -> pad to 8, not 128

    vmem_limit = _vmem_limit_bytes()
    block_budget = (vmem_limit * 7) // 10
    tile_c, cp, tile_p, pp = _choose_tiling(ckp, c_out, p, block_budget)
    n_c_tiles = cp // tile_c
    n_p_tiles = pp // tile_p

    patches = jnp.pad(patches, ((0, 0), (0, ckp - ck), (0, pp - p)))
    w_mat = weight.reshape(c_out, ck).astype(jnp.bfloat16)       # (C_out, CK), no transpose
    w_mat = jnp.pad(w_mat, ((0, cp - c_out), (0, ckp - ck)))     # (Cp, CKp)

    kernel = functools.partial(conv_block_kernel, p_real=float(p),
                               n_p_tiles=n_p_tiles, tile_p=tile_p)

    out = pl.pallas_call(
        kernel,
        out_shape=jax.ShapeDtypeStruct((n, cp, pp), jnp.bfloat16),
        grid_spec=pltpu.PrefetchScalarGridSpec(
            num_scalar_prefetch=0,
            grid=(n, n_c_tiles, n_p_tiles),
            in_specs=[
                pl.BlockSpec((1, ckp, tile_p), lambda i, c, j: (i, 0, j)),
                pl.BlockSpec((tile_c, ckp), lambda i, c, j: (c, 0)),
            ],
            # Output block is resident across the P-tile axis (index_map ignores j).
            out_specs=pl.BlockSpec((1, tile_c, pp), lambda i, c, j: (i, c, 0)),
            scratch_shapes=[
                pltpu.VMEM((tile_c, 1), jnp.float32),   # per-channel sum
                pltpu.VMEM((tile_c, 1), jnp.float32),   # per-channel sum of squares
            ],
        ),
        compiler_params=pltpu.CompilerParams(
            dimension_semantics=("parallel", "parallel", "arbitrary"),
            vmem_limit_bytes=vmem_limit,
        ),
    )(patches, w_mat)

    # De-pad (N, Cp, Pp) -> (N, C_out, H_out, W_out); f32 cast fuses into this copy.
    out = out[:, :c_out, :p].astype(jnp.float32)
    return out.reshape(n, c_out, h_out, w_out)


def reference_forward(x, weight, bias, *, stride=2, padding=1):
    """Pure-JAX reference: conv -> instance norm -> relu (f32)."""
    y = lax.conv_general_dilated(
        x.astype(jnp.float32), weight.astype(jnp.float32),
        window_strides=(stride, stride),
        padding=[(padding, padding), (padding, padding)],
        dimension_numbers=("NCHW", "OIHW", "NCHW"),
    ) + bias.reshape(1, -1, 1, 1)
    mean = jnp.mean(y, axis=(2, 3), keepdims=True)
    var = jnp.mean((y - mean) ** 2, axis=(2, 3), keepdims=True)
    yn = (y - mean) * lax.rsqrt(var + EPS)
    return jnp.maximum(yn, 0.0)


if __name__ == "__main__":
    # Small shapes: batch=2, C_in=4, spatial=16x16, C_out=8, k=3, s=2, p=1.
    key = jax.random.PRNGKey(0)
    kx, kw, kb = jax.random.split(key, 3)

    N, C_in, H, W = 2, 4, 16, 16
    C_out, K = 8, 3

    x = jax.random.normal(kx, (N, C_in, H, W), dtype=jnp.float32)

    # PyTorch Conv2d default init: U(-bound, bound), bound = 1/sqrt(fan_in).
    fan_in = C_in * K * K
    bound = 1.0 / (fan_in ** 0.5)
    weight = jax.random.uniform(kw, (C_out, C_in, K, K), jnp.float32, -bound, bound)
    bias = jax.random.uniform(kb, (C_out,), jnp.float32, -bound, bound)

    out = conv_block_forward(x, weight, bias, kernel_size=K, stride=2, padding=1)
    out = jax.block_until_ready(out)

    ref = reference_forward(x, weight, bias, stride=2, padding=1)
    assert out.shape == (N, C_out, H // 2, W // 2), out.shape
    # bf16 MXU operands + bf16 intermediate storage -> loosened tolerance vs f32 reference.
    max_err = float(jnp.max(jnp.abs(out - ref)))
    assert jnp.allclose(out, ref, atol=3e-2, rtol=3e-2), max_err

    print("KERNEL_OK")
</pallas_src>

<mosaic_0001>
module attributes {stable_mosaic.version = 11 : i64} {
  func.func @conv_block_kernel(%arg0: i32, %arg1: i32, %arg2: i32, %arg3: memref<1x40x128xbf16, #tpu.memory_space<vmem>>, %arg4: memref<8x40xbf16, #tpu.memory_space<vmem>>, %arg5: memref<1x8x128xbf16, #tpu.memory_space<vmem>>, %arg6: memref<8x1xf32, #tpu.memory_space<vmem>>, %arg7: memref<8x1xf32, #tpu.memory_space<vmem>>) attributes {dimension_semantics = [#tpu.dimension_semantics<parallel>, #tpu.dimension_semantics<parallel>, #tpu.dimension_semantics<arbitrary>], iteration_bounds = array<i64: 2, 1, 1>, scalar_prefetch = 0 : i64, scratch_operands = 2 : i64, tpu.core_type = #tpu.core_type<tc>, window_params = [{transform_indices = @transform_0, window_bounds = array<i64: 1, 40, 128>}, {transform_indices = @transform_1, window_bounds = array<i64: 8, 40>}, {transform_indices = @transform_2, window_bounds = array<i64: 1, 8, 128>}]} {
    %c0_i32 = arith.constant 0 : i32
    %0 = arith.cmpi eq, %arg2, %c0_i32 : i32
    %1 = arith.extui %0 : i1 to i32
    %c0_i32_0 = arith.constant 0 : i32
    %2 = arith.cmpi ne, %1, %c0_i32_0 : i32
    scf.if %2 {
      %cst_19 = arith.constant 0.000000e+00 : f32
      %28 = vector.broadcast %cst_19 : f32 to vector<8x1xf32>
      %c0_20 = arith.constant 0 : index
      %c0_21 = arith.constant 0 : index
      %29 = vector.load %arg6[%c0_20, %c0_21] : memref<8x1xf32, #tpu.memory_space<vmem>>, vector<8x1xf32>
      tpu.vector_store %arg6[%c0_20, %c0_21], %28 {strides = array<i32>} : memref<8x1xf32, #tpu.memory_space<vmem>>, vector<8x1xf32>,
      %cst_22 = arith.constant 0.000000e+00 : f32
      %30 = vector.broadcast %cst_22 : f32 to vector<8x1xf32>
      %c0_23 = arith.constant 0 : index
      %c0_24 = arith.constant 0 : index
      %31 = vector.load %arg7[%c0_23, %c0_24] : memref<8x1xf32, #tpu.memory_space<vmem>>, vector<8x1xf32>
      tpu.vector_store %arg7[%c0_23, %c0_24], %30 {strides = array<i32>} : memref<8x1xf32, #tpu.memory_space<vmem>>, vector<8x1xf32>,
    } else {
    }
    %c0 = arith.constant 0 : index
    %c0_1 = arith.constant 0 : index
    %3 = vector.load %arg4[%c0, %c0_1] : memref<8x40xbf16, #tpu.memory_space<vmem>>, vector<8x40xbf16>
    %c0_2 = arith.constant 0 : index
    %c0_3 = arith.constant 0 : index
    %c0_4 = arith.constant 0 : index
    %4 = vector.load %arg3[%c0_2, %c0_3, %c0_4] : memref<1x40x128xbf16, #tpu.memory_space<vmem>>, vector<1x40x128xbf16>
    %5 = vector.shape_cast %4 : vector<1x40x128xbf16> to vector<40x128xbf16>
    %cst = arith.constant dense<0.000000e+00> : vector<8x128xf32>
    %6 = tpu.matmul %3, %5, %cst {dimension_numbers = #tpu.dot_dimension_numbers<[1], [0], [0], [1], [0, 0, 1, 1], [], []>} : vector<8x40xbf16>, vector<40x128xbf16>, vector<8x128xf32> -> vector<8x128xf32>
    %c0_5 = arith.constant 0 : index
    %c0_6 = arith.constant 0 : index
    %7 = vector.load %arg6[%c0_5, %c0_6] : memref<8x1xf32, #tpu.memory_space<vmem>>, vector<8x1xf32>
    %cst_7 = arith.constant dense<0.000000e+00> : vector<8xf32>
    %8 = vector.multi_reduction <add>, %6, %cst_7 [1] : vector<8x128xf32> to vector<8xf32>
    %9 = vector.shape_cast %8 : vector<8xf32> to vector<8x1xf32>
    %10 = arith.addf %7, %9 : vector<8x1xf32>
    %c0_8 = arith.constant 0 : index
    %c0_9 = arith.constant 0 : index
    %11 = vector.load %arg6[%c0_8, %c0_9] : memref<8x1xf32, #tpu.memory_space<vmem>>, vector<8x1xf32>
    tpu.vector_store %arg6[%c0_8, %c0_9], %10 {strides = array<i32>} : memref<8x1xf32, #tpu.memory_space<vmem>>, vector<8x1xf32>,
    %c0_10 = arith.constant 0 : index
    %c0_11 = arith.constant 0 : index
    %12 = vector.load %arg7[%c0_10, %c0_11] : memref<8x1xf32, #tpu.memory_space<vmem>>, vector<8x1xf32>
    %13 = arith.mulf %6, %6 : vector<8x128xf32>
    %cst_12 = arith.constant dense<0.000000e+00> : vector<8xf32>
    %14 = vector.multi_reduction <add>, %13, %cst_12 [1] : vector<8x128xf32> to vector<8xf32>
    %15 = vector.shape_cast %14 : vector<8xf32> to vector<8x1xf32>
    %16 = arith.addf %12, %15 : vector<8x1xf32>
    %c0_13 = arith.constant 0 : index
    %c0_14 = arith.constant 0 : index
    %17 = vector.load %arg7[%c0_13, %c0_14] : memref<8x1xf32, #tpu.memory_space<vmem>>, vector<8x1xf32>
    tpu.vector_store %arg7[%c0_13, %c0_14], %16 {strides = array<i32>} : memref<8x1xf32, #tpu.memory_space<vmem>>, vector<8x1xf32>,
    %c128_i32 = arith.constant 128 : i32
    %18 = arith.muli %arg2, %c128_i32 : i32
    %19 = tpu.assume_multiple %18, 128 : i32
    %20 = arith.truncf %6 : vector<8x128xf32> to vector<8x128xbf16>
    %c0_15 = arith.constant 0 : index
    %c0_16 = arith.constant 0 : index
    %21 = arith.index_cast %19 : i32 to index
    %22 = vector.load %arg5[%c0_15, %c0_16, %21] : memref<1x8x128xbf16, #tpu.memory_space<vmem>>, vector<1x8x128xbf16>
    %23 = vector.shape_cast %22 : vector<1x8x128xbf16> to vector<8x128xbf16>
    %24 = vector.shape_cast %20 : vector<8x128xbf16> to vector<1x8x128xbf16>
    tpu.vector_store %arg5[%c0_15, %c0_16, %21], %24 {strides = array<i32>} : memref<1x8x128xbf16, #tpu.memory_space<vmem>>, vector<1x8x128xbf16>,
    %c0_i32_17 = arith.constant 0 : i32
    %25 = arith.cmpi eq, %arg2, %c0_i32_17 : i32
    %26 = arith.extui %25 : i1 to i32
    %c0_i32_18 = arith.constant 0 : i32
    %27 = arith.cmpi ne, %26, %c0_i32_18 : i32
    scf.if %27 {
      %c0_19 = arith.constant 0 : index
      %c0_20 = arith.constant 0 : index
      %28 = vector.load %arg6[%c0_19, %c0_20] : memref<8x1xf32, #tpu.memory_space<vmem>>, vector<8x1xf32>
      %cst_21 = arith.constant 1.562500e-02 : f32
      %29 = vector.broadcast %cst_21 : f32 to vector<8x1xf32>
      %30 = arith.mulf %28, %29 : vector<8x1xf32>
      %c0_22 = arith.constant 0 : index
      %c0_23 = arith.constant 0 : index
      %31 = vector.load %arg7[%c0_22, %c0_23] : memref<8x1xf32, #tpu.memory_space<vmem>>, vector<8x1xf32>
      %cst_24 = arith.constant 1.562500e-02 : f32
      %32 = vector.broadcast %cst_24 : f32 to vector<8x1xf32>
      %33 = arith.mulf %31, %32 : vector<8x1xf32>
      %34 = arith.mulf %30, %30 : vector<8x1xf32>
      %35 = arith.subf %33, %34 : vector<8x1xf32>
      %cst_25 = arith.constant 0.000000e+00 : f32
      %36 = vector.broadcast %cst_25 : f32 to vector<8x1xf32>
      %37 = arith.maximumf %35, %36 : vector<8x1xf32>
      %cst_26 = arith.constant 9.99999974E-6 : f32
      %38 = vector.broadcast %cst_26 : f32 to vector<8x1xf32>
      %39 = arith.addf %37, %38 : vector<8x1xf32>
      %40 = math.rsqrt %39 : vector<8x1xf32>
      %c0_i32_27 = arith.constant 0 : i32
      %c1_i32 = arith.constant 1 : i32
      %41 = arith.muli %c0_i32_27, %c1_i32 : i32
      %c0_i32_28 = arith.constant 0 : i32
      %42 = arith.addi %c0_i32_28, %41 : i32
      %c128_i32_29 = arith.constant 128 : i32
      %43 = arith.muli %42, %c128_i32_29 : i32
      %44 = tpu.assume_multiple %43, 128 : i32
      %c0_30 = arith.constant 0 : index
      %c0_31 = arith.constant 0 : index
      %45 = arith.index_cast %44 : i32 to index
      %46 = vector.load %arg5[%c0_30, %c0_31, %45] : memref<1x8x128xbf16, #tpu.memory_space<vmem>>, vector<1x8x128xbf16>
      %47 = vector.shape_cast %46 : vector<1x8x128xbf16> to vector<8x128xbf16>
      %48 = arith.extf %47 : vector<8x128xbf16> to vector<8x128xf32>
      %49 = vector.broadcast %30 : vector<8x1xf32> to vector<8x128xf32>
      %50 = arith.subf %48, %49 : vector<8x128xf32>
      %51 = vector.broadcast %40 : vector<8x1xf32> to vector<8x128xf32>
      %52 = arith.mulf %50, %51 : vector<8x128xf32>
      %cst_32 = arith.constant 0.000000e+00 : f32
      %53 = vector.broadcast %cst_32 : f32 to vector<8x128xf32>
      %54 = arith.maximumf %52, %53 : vector<8x128xf32>
      %55 = arith.truncf %54 : vector<8x128xf32> to vector<8x128xbf16>
      %c0_33 = arith.constant 0 : index
      %c0_34 = arith.constant 0 : index
      %56 = arith.index_cast %44 : i32 to index
      %57 = vector.load %arg5[%c0_33, %c0_34, %56] : memref<1x8x128xbf16, #tpu.memory_space<vmem>>, vector<1x8x128xbf16>
      %58 = vector.shape_cast %57 : vector<1x8x128xbf16> to vector<8x128xbf16>
      %59 = vector.shape_cast %55 : vector<8x128xbf16> to vector<1x8x128xbf16>
      tpu.vector_store %arg5[%c0_33, %c0_34, %56], %59 {strides = array<i32>} : memref<1x8x128xbf16, #tpu.memory_space<vmem>>, vector<1x8x128xbf16>,
      %c1_i32_35 = arith.constant 1 : i32
    } else {
    }
    return
  }
  func.func @transform_0(%arg0: i32, %arg1: i32, %arg2: i32) -> (i32, i32, i32) {
    %c0_i32 = arith.constant 0 : i32
    %c0_i32_0 = arith.constant 0 : i32
    return %arg0, %c0_i32, %arg2 : i32, i32, i32
  }
  func.func @transform_1(%arg0: i32, %arg1: i32, %arg2: i32) -> (i32, i32) {
    %c0_i32 = arith.constant 0 : i32
    %c0_i32_0 = arith.constant 0 : i32
    return %arg1, %c0_i32 : i32, i32
  }
  func.func @transform_2(%arg0: i32, %arg1: i32, %arg2: i32) -> (i32, i32, i32) {
    %c0_i32 = arith.constant 0 : i32
    %c0_i32_0 = arith.constant 0 : i32
    return %arg0, %arg1, %c0_i32 : i32, i32, i32
  }
}

</mosaic_0001>

<bundles_post_ra>
// kernel: conv_block_forward.1
= control target key start
LH: loop header
LB: loop body
LE: loop exit
PB: predicated region body
PF: predicated region fallthrough
CT: control target
= control target key end

     0   :  { %s495_s9 = smov 0   ;;  %s497_s10 = smov 0   ;;  %s540_s0 = inlined_call_operand.vmem [shape: bf16[2,40,128], index: 0, kind: input, shape index: {}]   ;;  %s541_s1 = inlined_call_operand.vmem [shape: bf16[8,40], index: 1, kind: input, shape index: {}]   ;;  %s542_s2 = inlined_call_operand.vmem [shape: bf16[2,8,128], index: 2, kind: output, shape index: {}]  }
   0x1   :  { %s499_s11 = smov 0  }
   0x2 LB: > { %s31_s12 = sadd.s32 1, %s472_s10  ;;  %p407_p0 = scmp.ge.s32.totalorder %s476_s11, 1  ;;  %s476_s11 = sphi %s499_s11, %s12_s11   ;;  %s472_s10 = sphi %s497_s10, %s544_s10   ;;  %s468_s9 = sphi %s495_s9, %s543_s9  }
   0x3   : > { %p33_p1 = scmp.ge.s32.totalorder %s31_s12, 2  ;;  %p147_p2 = scmp.lt.s32.totalorder %s476_s11, 3 }
   0x5   : > { %s546_s12 = smov (%p33_p1, %s31_s12), 0  ;;  %p148_p3 = pnand %p407_p0, %p147_p2 }
   0x6   : > { %p178_p4 = scmp.lt.s32.totalorder (!%p148_p3), %s468_s9, 1 }
   0x7   : > { %151 = sbr.rel (%p148_p3) target bundleno = 441 (0x1b9), region = 28 }
   0xc   : > { %s548_s9 = smov (!%p178_p4, %s468_s9), 1  ;;  %vm230_vm0 = vcmask 1043456   ;;  %v205_v6 = vld [vmem:[%s541_s1] sm:$0xf]  ;;  %vm226_vm1 = vcmask 326656   ;;  %vm202_vm2 = vcmask 7168  }
   0xd   : > { %s423_s13 = smul.u32 20, %s548_s9  ;;  %v478_v7 = vmov 0.0   ;;  %s409_s19 = sshll.u32 %s548_s9, 2  ;;  %v479_v12 = vmov 0  }
   0xe   : > { %203 = vst.msk [vmem:[#allocation2] sm:$0xff] %vm202_vm2, %v478_v7  ;;  %s524_s22 = scalar_lea.vmem %s542_s2, %s409_s19  ;;  %450 = vset.pattern.permute.xlu1 %v479_v12  ;;  %451 = vset.pattern.permute.xlu0 %v479_v12 }
   0xf   : > { %s185_s16 = scalar_lea.vmem %s540_s0, %s423_s13  ;;  %204 = vst.msk [vmem:[#allocation3] sm:$0xff] %vm202_vm2, %v478_v7 }
  0x10   : > { %v210_v0 = vld [vmem:[%s185_s16 + $0x10] sm:$0xf]  ;;  %v422_v4 = vld [vmem:[%s185_s16 + $0x8] sm:$0xff]  ;;  %v421_v5 = vld [vmem:[%s185_s16] sm:$0xff] }
  0x11   : > { %v220_v1 = vunpack.c.l.b16 %v210_v0 }
  0x13   : > { %v223_v2 = vpack.c.b16 %v220_v1, %v220_v1 }
  0x15   : > { %v232_v3 = vsel %vm230_vm0, %v223_v2, 0  ;;  %v247_v13 = vld [vmem:[#allocation2] sm:$0xff] }
  0x16   : > { %239 = vmatpush.bf16.msra.mxu0 %v232_v3  ;;  %v253_v16 = vld [vmem:[#allocation3] sm:$0xff] }
  0x1a   : > { %240 = vmatpush.bf16.msra.mxu0 %v422_v4 }
  0x1e   : > { %241 = vmatpush.bf16.msra.mxu0 %v421_v5 }
  0x21   : > { %418 = vmatmul.msk.bf16.vlgmr.msra.gmra.mxu0 %vm226_vm1, %v205_v6 }
  0x9e   : > { %v243_v8 = vpop.f32.mrf.mxu0 }
  0x9f   : > { %v260_v9 = vpack.c.bf16 %v243_v8, %v243_v8  ;;  %248 = vadd.xlane.f32.xlu0 %v243_v8  ;;  %v254_v10 = vmul.f32 %v243_v8, %v243_v8 }
  0xa1   : > { %265 = vst [vmem:[%s524_s22] sm:$0xf] %v260_v9 }
  0xa6   : > { %v245_v11 = vpop.f32.mrf.mxu0 }
  0xa7   : > { %255 = vadd.xlane.f32.xlu0 %v254_v10 }
  0xa8   : > { %v287_v35 = vld [vmem:[%s524_s22] sm:$0xf] }
  0xa9   : > { %v288_v36 = vunpack.c.l.bf16 %v287_v35 }
 0x112   : > { %v249_v14 = vpop.xlane.xlu0 %248 }
 0x113   : > { %v250_v15 = vadd.f32 %v249_v14, %v247_v13 }
 0x115   : > { %252 = vst.msk [vmem:[#allocation2] sm:$0xff] %vm202_vm2, %v250_v15 }
 0x11a   : > { %v256_v17 = vpop.xlane.xlu0 %255 }
 0x11b   : > { %v257_v18 = vadd.f32 %v256_v17, %v253_v16 }
 0x11c   : > { %v269_v19 = vld [vmem:[#allocation2] sm:$0xff] }
 0x11d   : > { %258 = vst.msk [vmem:[#allocation3] sm:$0xff] %vm202_vm2, %v257_v18  ;;  %v270_v20 = vmul.f32 0.015625, %v269_v19 }
 0x11f   : > { %291 = vperm.xlu1 %450, %v270_v20   ;;  %v273_v23 = vmul.f32 %v270_v20, %v270_v20 }
 0x124   : > { %v271_v21 = vld [vmem:[#allocation3] sm:$0xff] }
 0x125   : > { %v272_v22 = vmul.f32 0.015625, %v271_v21 }
 0x127   : > { %v274_v24 = vsub.f32 %v272_v22, %v273_v23 }
 0x129   : > { %v275_v25 = vmax.f32 %v274_v24, 0.0 }
 0x12b   : > { %v276_v26 = vadd.f32 1e-05, %v275_v25 }
 0x12d   : > { %452 = vrsqrt.f32 %v276_v26  ;;  %vm283_vm4 = vweird.f32 %v276_v26 }
 0x133   : > { %v453_v27 = vpop.eup %452 }
 0x134   : > { %v278_v28 = vmul.f32 %v453_v27, %v276_v26  ;;  %vm284_vm3 = vweird.f32 %v453_v27 }
 0x135   : > { %vm285_vm5 = vmor %vm283_vm4, %vm284_vm3 }
 0x136   : > { %v279_v29 = vmul.f32 %v453_v27, %v278_v28 }
 0x138   : > { %v280_v30 = vmul.f32 0.5, %v279_v29 }
 0x13a   : > { %v281_v31 = vsub.f32 1.5, %v280_v30 }
 0x13c   : > { %v282_v32 = vmul.f32 %v453_v27, %v281_v31 }
 0x13e   : > { %v286_v33 = vsel %vm285_vm5, %v453_v27, %v282_v32 }
 0x13f   : > { %297 = vperm.xlu1 %450, %v286_v33  }
 0x191   : > { %v292_v34 = vpop.permute.xlu1 %291 }
 0x192   : > { %v294_v37 = vsub.f32 %v288_v36, %v292_v34 }
 0x1b1   : > { %v298_v38 = vpop.permute.xlu1 %297 }
 0x1b2   : > { %v300_v39 = vmul.f32 %v298_v38, %v294_v37 }
 0x1b4   : > { %v301_v40 = vmax.f32 %v300_v39, 0.0 }
 0x1b6   : > { %v302_v41 = vpack.c.bf16 %v301_v40, %v301_v40 }
 0x1b8   : > { %303 = vst [vmem:[%s524_s22] sm:$0xf] %v302_v41 }
 0x1b9 PF: > { %s12_s11 = sadd.s32 1, %s476_s11   ;;  %s543_s9 = smov %s472_s10 }
 0x1ba   : > { %p9_p5 = scmp.ge.s32.totalorder %s12_s11, 4   ;;  %s544_s10 = smov %s546_s12 }
 0x1bc   :  { %11 = sbr.rel (!%p9_p5) target bundleno = 2 (0x2), region = 70 }

</bundles_post_ra>
